<compile_context>
chip_gen: v7x
topology: tpu7x:2x2x1
jax: 0.10.0
libtpu: 0.0.40
codegen_flags: <defaults>
</compile_context>

<pallas_src>
import math

import jax
import jax.numpy as jnp
from jax.experimental import pallas as pl
from jax.experimental.pallas import tpu as pltpu


def _pe_add_kernel(x_ref, pe_ref, o_ref):
    # x_ref: (b_tile, chunk)   pe_ref: (1, chunk)   o_ref: (b_tile, chunk)
    # pe broadcasts over the batch (sublane) axis; pure VPU add, HBM-BW bound.
    o_ref[...] = x_ref[...] + pe_ref[...]


def make_positional_encoding(d_model, max_len=5000):
    """Builds the same sin/cos buffer as the PyTorch module (even d_model)."""
    assert d_model % 2 == 0, "PositionalEncoding requires even d_model"
    position = jnp.arange(max_len, dtype=jnp.float32)[:, None]            # (L, 1)
    div_term = jnp.exp(
        jnp.arange(0, d_model, 2, dtype=jnp.float32)
        * (-(math.log(10000.0) / d_model))
    )                                                                     # (d/2,)
    angles = position * div_term                                          # (L, d/2)
    pe = jnp.zeros((max_len, d_model), dtype=jnp.float32)
    pe = pe.at[:, 0::2].set(jnp.sin(angles))
    pe = pe.at[:, 1::2].set(jnp.cos(angles))
    return pe                                                             # (L, d)


def prepare_pe_table(pe, seq_len, dtype):
    """One-time setup: slice + cast + flatten the pe buffer.

    Call once per (seq_len, dtype) at module/parameter setup time (not per
    forward) so the slice/cast HBM traffic is not paid on every call.
    """
    max_len, d_model = pe.shape
    assert max_len >= seq_len
    return pe[:seq_len].astype(dtype).reshape(1, seq_len * d_model)      # (1, S*D)


def _sublane_pack(itemsize):
    # Sublane packing tile for the dtype: 8 (fp32), 16 (bf16/fp16), 32 (int8/fp8).
    return {4: 8, 2: 16, 1: 32}.get(itemsize, 8)


def positional_encoding_forward(x, pe2, *, target_block_bytes=4 * 1024 * 1024):
    """x: (batch, seq, d_model); pe2: (1, seq*d_model) already in x.dtype."""
    B, S, D = x.shape
    SD = S * D
    assert pe2.shape == (1, SD)
    assert pe2.dtype == x.dtype

    # Flatten (seq, d_model) so the kernel's last dim is lane-dense even when
    # d_model < 128. Contiguous reshapes are metadata-only.
    x2 = x.reshape(B, SD)

    itemsize = jnp.dtype(x.dtype).itemsize
    sublane = _sublane_pack(itemsize)

    # Batch tile: full batch if small (full-extent blocks bypass the sublane
    # constraint); otherwise a multiple of the dtype packing tile, up to 4x it
    # (32 fp32 / 64 bf16 / 128 int8 rows) to shrink pe-overhead and step count.
    if B <= sublane:
        b_tile = B
    else:
        b_tile = min((B // sublane) * sublane, 4 * sublane)

    # Lane-axis chunk: ~target_block_bytes per x block, multiple of 128, or the
    # full flattened extent if it is small.
    chunk = target_block_bytes // (b_tile * itemsize)
    chunk = max(128, (chunk // 128) * 128)
    if chunk >= SD:
        chunk = SD

    # Chunk axis OUTER, batch-tile axis INNER: pe block index is constant across
    # consecutive steps, so the same pe chunk is not re-DMA'd per batch tile.
    grid = (pl.cdiv(SD, chunk), pl.cdiv(B, b_tile))

    out = pl.pallas_call(
        _pe_add_kernel,
        out_shape=jax.ShapeDtypeStruct((B, SD), x.dtype),
        grid_spec=pltpu.PrefetchScalarGridSpec(
            num_scalar_prefetch=0,
            grid=grid,
            in_specs=[
                pl.BlockSpec((b_tile, chunk), lambda i, b: (b, i)),
                pl.BlockSpec((1, chunk), lambda i, b: (0, i)),
            ],
            out_specs=pl.BlockSpec((b_tile, chunk), lambda i, b: (b, i)),
        ),
        input_output_aliases={0: 0},   # output aliases x (in-place when donated)
        compiler_params=pltpu.CompilerParams(
            dimension_semantics=("parallel", "parallel"),
            vmem_limit_bytes=32 * 1024 * 1024,
        ),
    )(x2, pe2)

    # Dropout: eval-mode identity (see TODO at top of file).
    return out.reshape(B, S, D)


def positional_encoding_ref(x, pe):
    # Pure-JAX reference mirroring the PyTorch forward (dropout in eval mode).
    return x + pe[None, : x.shape[1], :].astype(x.dtype)


if __name__ == "__main__":
    key = jax.random.PRNGKey(0)
    batch, seq, d_model = 2, 8, 32
    x = jax.random.normal(key, (batch, seq, d_model), dtype=jnp.float32)

    pe = make_positional_encoding(d_model, max_len=5000)

    # Reference computed BEFORE the kernel (output may alias x's buffer when
    # the caller donates x inside a jit).
    ref = positional_encoding_ref(x, pe)

    # One-time setup (cached by the caller in a real model).
    pe2 = prepare_pe_table(pe, seq, x.dtype)

    fwd = jax.jit(positional_encoding_forward)
    out = fwd(x, pe2)
    out = jax.block_until_ready(out)

    assert out.shape == x.shape
    assert jnp.allclose(out, ref, atol=1e-6, rtol=1e-6)

    print("KERNEL_OK")
</pallas_src>

<mosaic_0001>
module attributes {stable_mosaic.version = 11 : i64} {
  func.func @_pe_add_kernel(%arg0: i32, %arg1: i32, %arg2: memref<2x256xf32, #tpu.memory_space<vmem>>, %arg3: memref<1x256xf32, #tpu.memory_space<vmem>>, %arg4: memref<2x256xf32, #tpu.memory_space<vmem>>) attributes {dimension_semantics = [#tpu.dimension_semantics<parallel>, #tpu.dimension_semantics<parallel>], iteration_bounds = array<i64: 1, 1>, scalar_prefetch = 0 : i64, scratch_operands = 0 : i64, tpu.core_type = #tpu.core_type<tc>, window_params = [{transform_indices = @transform_0, window_bounds = array<i64: 2, 256>}, {transform_indices = @transform_1, window_bounds = array<i64: 1, 256>}, {transform_indices = @transform_2, window_bounds = array<i64: 2, 256>}]} {
    %c0 = arith.constant 0 : index
    %c0_0 = arith.constant 0 : index
    %0 = vector.load %arg2[%c0, %c0_0] : memref<2x256xf32, #tpu.memory_space<vmem>>, vector<2x256xf32>
    %c0_1 = arith.constant 0 : index
    %c0_2 = arith.constant 0 : index
    %1 = vector.load %arg3[%c0_1, %c0_2] : memref<1x256xf32, #tpu.memory_space<vmem>>, vector<1x256xf32>
    %2 = vector.broadcast %1 : vector<1x256xf32> to vector<2x256xf32>
    %3 = arith.addf %0, %2 : vector<2x256xf32>
    %c0_3 = arith.constant 0 : index
    %c0_4 = arith.constant 0 : index
    %4 = vector.load %arg4[%c0_3, %c0_4] : memref<2x256xf32, #tpu.memory_space<vmem>>, vector<2x256xf32>
    tpu.vector_store %arg4[%c0_3, %c0_4], %3 {strides = array<i32>} : memref<2x256xf32, #tpu.memory_space<vmem>>, vector<2x256xf32>,
    return
  }
  func.func @transform_0(%arg0: i32, %arg1: i32) -> (i32, i32) {
    %c0_i32 = arith.constant 0 : i32
    return %arg1, %arg0 : i32, i32
  }
  func.func @transform_1(%arg0: i32, %arg1: i32) -> (i32, i32) {
    %c0_i32 = arith.constant 0 : i32
    %c0_i32_0 = arith.constant 0 : i32
    return %c0_i32, %arg0 : i32, i32
  }
  func.func @transform_2(%arg0: i32, %arg1: i32) -> (i32, i32) {
    %c0_i32 = arith.constant 0 : i32
    return %arg1, %arg0 : i32, i32
  }
}

</mosaic_0001>

<bundles_post_ra>
// kernel: positional_encoding_forward.1
= control target key start
LH: loop header
LB: loop body
LE: loop exit
PB: predicated region body
PF: predicated region fallthrough
CT: control target
= control target key end

     0   :  { %v14_v0 = vlaneseq  ;;  %v38_v1 = vmov 1983009808   ;;  %s63_s1 = inlined_call_operand.vmem [shape: f32[1,256], index: 1, kind: input, shape index: {}]   ;;  %s64_s0 = inlined_call_operand.vmem [shape: f32[2,256], index: 0, kind: input, shape index: {}, may-alias: {0,2}]   ;;  %s65_s2 = inlined_call_operand.vmem [shape: f32[2,256], index: 2, kind: output, shape index: {}, may-alias: {0,2}]  }
   0x1   :  { %v24_v2 = vunpack.c.l.s4 %v38_v1  ;;  %v12_v4 = vld [vmem:[%s63_s1] sm:$0x3] }
   0x2   :  { %v15_v3 = vshrl.u32 %v14_v0, 7  ;;  %v11_v12 = vld [vmem:[%s64_s0] sm:$0xf] }
   0x3   :  { %v25_v5 = vunpack.c.0.s8 %v24_v2 }
   0x4   :  { %v16_v6 = vsub.s32 0, %v15_v3  ;;  %v20_v7 = vsub.s32 1, %v15_v3 }
   0x5   :  { %v28_v10 = vsub.s32 %v25_v5, %v15_v3 }
   0x6   :  { %v17_v8 = vrot.slane %v12_v4, %v16_v6  ;;  %v21_v9 = vrot.slane %v12_v4, %v20_v7 }
   0x8   :  { %v22_v11 = vcombine.low %v17_v8, %v21_v9 }
   0xa   :  { %v29_v13 = vrot.slane %v22_v11, %v28_v10 }
   0xc   :  { %v31_v14 = vadd.f32 %v29_v13, %v11_v12 }
   0xe   :  { %32 = vst [vmem:[%s65_s2] sm:$0xf] %v31_v14 }

</bundles_post_ra>
